<compile_context>
chip_gen: v5e
topology: v5e:2x2
jax: 0.10.0
libtpu: 0.0.40
codegen_flags: <defaults>
</compile_context>

<pallas_src>
import jax
import jax.numpy as jnp
from jax import lax
from jax.experimental import pallas as pl
from jax.experimental.pallas import tpu as pltpu


def _wik_last_token_kernel(last_ref, w_ref, o_ref):
    # last_ref: (TB, H) bf16   w_ref: (2, H) bf16   o_ref: (2, TB) bf16 (lane-dense on B)
    # logits^T = W @ last^T, expressed as a contraction on H for BOTH operands so no
    # operand is transposed/materialized in VMEM. Accumulate in f32 on the MXU.
    logits_t = lax.dot_general(
        w_ref[...],                      # [2, H]
        last_ref[...],                   # [TB, H]
        dimension_numbers=(((1,), (1,)), ((), ())),
        preferred_element_type=jnp.float32,
    )                                    # [2, TB]
    o_ref[...] = logits_t.astype(o_ref.dtype)


def calibration_decoder_head(hidden_states, wik_weight, *, block_b=128):
    """hidden_states: [B, S, H] bf16, wik_weight: [2, H] bf16 -> logits [B, 2] bf16."""
    B, S, H = hidden_states.shape

    # Last-token select outside the kernel: XLA fuses this slice with the producer,
    # and the kernel only DMAs [B, H] instead of [B, S, H].
    last = hidden_states[:, -1, :]                       # [B, H]

    tb = B if B <= block_b else block_b                  # full batch or 128-row tiles
    grid = (pl.cdiv(B, tb),)

    logits_t = pl.pallas_call(
        _wik_last_token_kernel,
        out_shape=jax.ShapeDtypeStruct((2, B), hidden_states.dtype),
        grid=grid,
        in_specs=[
            pl.BlockSpec((tb, H), lambda i: (i, 0)),     # last-token activations tile
            pl.BlockSpec((2, H), lambda i: (0, 0)),      # wik weight, lane-dense [2, H]
        ],
        out_specs=pl.BlockSpec((2, tb), lambda i: (0, i)),  # batch on lanes
        compiler_params=pltpu.CompilerParams(
            dimension_semantics=("parallel",),           # shard B tiles across cores
        ),
    )(last, wik_weight)

    return logits_t.T                                    # [B, 2], matches wik(h)[:, -1]


if __name__ == "__main__":
    # Small shapes consistent with the forward pass: batch=2, seq=8, hidden=32.
    B, S, H = 2, 8, 32
    key = jax.random.PRNGKey(0)

    # Deterministic "last_hidden_state" stand-in for the backbone output.
    hidden_states = jax.random.normal(key, (B, S, H), dtype=jnp.float32).astype(jnp.bfloat16)

    # wik = Linear(H, 2, bias=False); weight.data.fill_(1)  -> all-ones [2, H] in bf16.
    wik_weight = jnp.ones((2, H), dtype=jnp.bfloat16)

    logits = calibration_decoder_head(hidden_states, wik_weight)
    logits = jax.block_until_ready(logits)

    # Reference check (pure JAX): wik(hidden)[:, -1]
    ref = jnp.dot(
        hidden_states[:, -1, :].astype(jnp.float32),
        wik_weight.T.astype(jnp.float32),
    ).astype(jnp.bfloat16)
    assert logits.shape == (B, 2), logits.shape
    assert jnp.allclose(logits.astype(jnp.float32), ref.astype(jnp.float32), atol=1e-2, rtol=1e-2)

    print("KERNEL_OK")
</pallas_src>

<mosaic_0001>
module attributes {stable_mosaic.version = 11 : i64} {
  func.func @_wik_last_token_kernel(%arg0: i32, %arg1: memref<2x32xbf16, #tpu.memory_space<vmem>>, %arg2: memref<2x32xbf16, #tpu.memory_space<vmem>>, %arg3: memref<2x2xbf16, #tpu.memory_space<vmem>>) attributes {dimension_semantics = [#tpu.dimension_semantics<parallel>], iteration_bounds = array<i64: 1>, scalar_prefetch = 0 : i64, scratch_operands = 0 : i64, tpu.core_type = #tpu.core_type<tc>, window_params = [{transform_indices = @transform_0, window_bounds = array<i64: 2, 32>}, {pipeline_mode = #tpu.pipeline_mode<synchronous>, transform_indices = @transform_1, window_bounds = array<i64: 2, 32>}, {transform_indices = @transform_2, window_bounds = array<i64: 2, 2>}]} {
    %c0 = arith.constant 0 : index
    %c0_0 = arith.constant 0 : index
    %0 = vector.load %arg2[%c0, %c0_0] : memref<2x32xbf16, #tpu.memory_space<vmem>>, vector<2x32xbf16>
    %c0_1 = arith.constant 0 : index
    %c0_2 = arith.constant 0 : index
    %1 = vector.load %arg1[%c0_1, %c0_2] : memref<2x32xbf16, #tpu.memory_space<vmem>>, vector<2x32xbf16>
    %cst = arith.constant dense<0.000000e+00> : vector<2x2xf32>
    %2 = tpu.matmul %0, %1, %cst {dimension_numbers = #tpu.dot_dimension_numbers<[1], [1], [0], [0], [0, 0, 1, 0], [], []>} : vector<2x32xbf16>, vector<2x32xbf16>, vector<2x2xf32> -> vector<2x2xf32>
    %3 = arith.truncf %2 : vector<2x2xf32> to vector<2x2xbf16>
    %c0_3 = arith.constant 0 : index
    %c0_4 = arith.constant 0 : index
    %4 = vector.load %arg3[%c0_3, %c0_4] : memref<2x2xbf16, #tpu.memory_space<vmem>>, vector<2x2xbf16>
    tpu.vector_store %arg3[%c0_3, %c0_4], %3 {strides = array<i32>} : memref<2x2xbf16, #tpu.memory_space<vmem>>, vector<2x2xbf16>,
    return
  }
  func.func @transform_0(%arg0: i32) -> (i32, i32) {
    %c0_i32 = arith.constant 0 : i32
    %c0_i32_0 = arith.constant 0 : i32
    return %arg0, %c0_i32 : i32, i32
  }
  func.func @transform_1(%arg0: i32) -> (i32, i32) {
    %c0_i32 = arith.constant 0 : i32
    %c0_i32_0 = arith.constant 0 : i32
    %c0_i32_1 = arith.constant 0 : i32
    return %c0_i32, %c0_i32_0 : i32, i32
  }
  func.func @transform_2(%arg0: i32) -> (i32, i32) {
    %c0_i32 = arith.constant 0 : i32
    %c0_i32_0 = arith.constant 0 : i32
    return %c0_i32, %arg0 : i32, i32
  }
}

</mosaic_0001>

<bundles_post_ra>
// kernel: tpu_custom_call.1
= control target key start
LH: loop header
LB: loop body
LE: loop exit
PB: predicated region body
PF: predicated region fallthrough
CT: control target
= control target key end

     0   :  { %7 = vsyncpa [#allocation3], 0  ;;  %s193_s0 = inlined_call_operand.hbm [shape: bf16[2,32], index: 0, kind: input, shape index: {}]   ;;  %s194_s1 = inlined_call_operand.hbm [shape: bf16[2,32], index: 1, kind: input, shape index: {}]   ;;  %s195_s2 = inlined_call_operand.hbm [shape: bf16[2,2], index: 2, kind: output, shape index: {}]  }
   0x1   :  { %8 = vsyncpa [#allocation6], 0 }
   0x2   :  { %9 = vsyncpa [#allocation4], 0  ;;  %s15_s11 = sshll.u32 %s193_s0, 4  ;;  %s166_s12 = smov [#allocation2]   ;;  %s16_s11 = int_to_ptr.hbm [resolvable:$true] %s15_s11 }
   0x3   :  { %s17_s13 = sshll.u32 %s166_s12, 4  ;;  %s26_s16 = sshll.u32 %s194_s1, 4  ;;  %s18_s13 = int_to_ptr.vmem [resolvable:$true] %s17_s13  ;;  %s27_s16 = int_to_ptr.hbm [resolvable:$true] %s26_s16 }
   0x4   :  { %20 = dma.hbm_to_vmem [thread:$0]  %s16_s11, 16, %s18_s13, [#allocation3]  }
   0x5   :  { %s167_s17 = smov [#allocation5]  }
   0x6   :  { %s28_s18 = sshll.u32 %s167_s17, 4  ;;  %s29_s18 = int_to_ptr.vmem [resolvable:$true] %s28_s18 }
   0x7   :  { %31 = dma.hbm_to_vmem [thread:$0]  %s27_s16, 16, %s29_s18, [#allocation6]  }
   0x8   :  { %160 = dma.done.wait [#allocation3], 16  }
   0x9   :  { %161 = vsyncadd [#allocation3], 4294967280 }
   0xa   :  { %162 = dma.done.wait [#allocation6], 16  }
   0xb   :  { %163 = vsyncadd [#allocation6], 4294967280  ;;  %vm43_vm0 = vcmask 261120   ;;  %v42_v0 = vld [vmem:[#allocation2] sm:$0x1]  ;;  %s168_s0 = smov [#allocation7]  }
   0xc   :  { %v48_v1 = vsel %vm43_vm0, %v42_v0, 0  ;;  %v41_v2 = vld [vmem:[#allocation5] sm:$0x1]  ;;  %s71_s19 = sshll.u32 %s168_s0, 4  ;;  %s73_s21 = sshll.u32 %s195_s2, 4  ;;  %vm64_vm1 = vcmask 8192   ;;  %s72_s19 = int_to_ptr.vmem [resolvable:$true] %s71_s19  ;;  %s74_s21 = int_to_ptr.hbm [resolvable:$true] %s73_s21 }
   0xd   :  { %57 = vmatpush.bf16.xpose.msra.mxu0 %v48_v1 }
  0x14   :  { %84 = vmatmul.msk.bf16.vlgmr.msra.gmra.mxu0 %vm43_vm0, %v41_v2 }
  0x91   :  { %v59_v3 = vpop.f32.mrf.mxu0 }
  0x92   :  { %v63_v4 = vpack.c.bf16 %v59_v3, %v59_v3 }
  0x94   :  { %65 = vst.msk [vmem:[#allocation7] sm:$0x1] %vm64_vm1, %v63_v4 }
  0x95   :  { %76 = dma.vmem_to_hbm [thread:$0]  %s72_s19, 16, %s74_s21, [#allocation4]  }
  0x99   :  { %v61_v5 = vpop.f32.mrf.mxu0 }
  0x9a   :  { %164 = dma.done.wait [#allocation4], 16  }
  0x9b   :  { %165 = vsyncadd [#allocation4], 4294967280 }
  0x9c   :  { %81 = vsyncpa [#allocation3], 1 }
  0x9d   :  { %82 = vsyncpa [#allocation6], 1 }
  0x9e   :  { %83 = vsyncpa [#allocation4], 1 }

</bundles_post_ra>
